<compile_context>
chip_gen: v5e
topology: v5e:2x2
jax: 0.10.0
libtpu: 0.0.40
codegen_flags: <defaults>
</compile_context>

<pallas_src>
import functools
import math

import jax
import jax.numpy as jnp
from jax.experimental import pallas as pl
from jax.experimental.pallas import tpu as pltpu

_BN_EPS = 1e-5


def _round_up(x, m):
    return (x + m - 1) // m * m


# ----------------------------------------------------------------------------
# Tiling policy (shared by weight preparation and the GEMM wrapper)
# ----------------------------------------------------------------------------
def _gemm_kn(K, N):
    """Returns (Kp, TK, Np, TN) for a GEMM with reduction K and output N."""
    Np = _round_up(N, 128)
    TN = 256 if Np % 256 == 0 else 128          # fill the 256x256 MXU when possible
    if K <= 1024:
        Kp, TK = K, K                           # single K step, full-extent block
    else:
        Kp = _round_up(K, 128)
        d_total = Kp // 128
        TK = 128
        for d in range(min(d_total, 8), 0, -1):  # TK <= 1024, divides Kp
            if d_total % d == 0:
                TK = d * 128
                break
    return Kp, TK, Np, TN


def _gemm_m(M):
    if M >= 2048:
        TM = 512
    elif M >= 512:
        TM = 256
    else:
        Mp = _round_up(M, 8)
        return Mp, Mp
    return _round_up(M, TM), TM


# ----------------------------------------------------------------------------
# Pallas kernels
# ----------------------------------------------------------------------------
def _gemm_bn_kernel(*refs, relu, has_residual):
    """acc += A@B over the K grid axis; epilogue: *scale + bias (+res) (+relu)."""
    if has_residual:
        a_ref, b_ref, s_ref, c_ref, r_ref, o_ref, acc_ref = refs
    else:
        a_ref, b_ref, s_ref, c_ref, o_ref, acc_ref = refs
        r_ref = None

    k = pl.program_id(2)

    @pl.when(k == 0)
    def _():
        acc_ref[...] = jnp.zeros_like(acc_ref)

    acc_ref[...] += jnp.dot(a_ref[...], b_ref[...],
                            preferred_element_type=jnp.float32)

    @pl.when(k == pl.num_programs(2) - 1)
    def _():
        out = acc_ref[...] * s_ref[...] + c_ref[...]
        if r_ref is not None:
            out = out + r_ref[...]
        if relu:
            out = jnp.maximum(out, 0.0)
        o_ref[...] = out


def _max9_kernel(x_ref, o_ref):
    # x_ref: (9, TR, C) -> max over the 9 pooling-window taps.
    o_ref[...] = jnp.max(x_ref[...], axis=0)


def _avgpool_kernel(x_ref, o_ref):
    # x_ref: (1, S, C) -> mean over spatial S.
    o_ref[...] = jnp.mean(x_ref[...], axis=1, keepdims=True)


# ----------------------------------------------------------------------------
# GEMM wrapper:  out = relu_opt((A @ B) * scale + bias [+ residual])
# ----------------------------------------------------------------------------
def gemm_bn(a, b_p, scale_p, bias_p, K, N, relu, residual=None):
    """a: (M, K) activations (any float dtype, cast to bf16 here).
    b_p: (Kp, Np) pre-padded bf16 weights.  scale_p/bias_p: (1, Np) f32.
    residual: optional (M, N) f32, added before the ReLU."""
    M = a.shape[0]
    Kp, TK, Np, TN = _gemm_kn(K, N)
    Mp, TM = _gemm_m(M)

    a_p = a
    if (Mp, Kp) != (M, K):
        a_p = jnp.pad(a, ((0, Mp - M), (0, Kp - K)))
    a_p = a_p.astype(jnp.bfloat16)

    nk = Kp // TK
    grid = (Mp // TM, Np // TN, nk)

    in_specs = [
        pl.BlockSpec((TM, TK), lambda i, j, k: (i, k)),
        pl.BlockSpec((TK, TN), lambda i, j, k: (k, j)),
        pl.BlockSpec((1, TN), lambda i, j, k: (0, j)),
        pl.BlockSpec((1, TN), lambda i, j, k: (0, j)),
    ]
    args = [a_p, b_p, scale_p, bias_p]

    has_residual = residual is not None
    if has_residual:
        r_p = residual
        if (Mp, Np) != (M, N):
            r_p = jnp.pad(residual, ((0, Mp - M), (0, Np - N)))
        in_specs.append(pl.BlockSpec((TM, TN), lambda i, j, k: (i, j)))
        args.append(r_p)

    bytes_accessed = (Mp * Kp + Kp * Np) * 2 + Mp * Np * 4
    if has_residual:
        bytes_accessed += Mp * Np * 4

    out = pl.pallas_call(
        functools.partial(_gemm_bn_kernel, relu=relu, has_residual=has_residual),
        out_shape=jax.ShapeDtypeStruct((Mp, Np), jnp.float32),
        grid=grid,
        in_specs=in_specs,
        out_specs=pl.BlockSpec((TM, TN), lambda i, j, k: (i, j)),
        scratch_shapes=[pltpu.VMEM((TM, TN), jnp.float32)],
        compiler_params=pltpu.CompilerParams(
            dimension_semantics=("parallel", "parallel", "arbitrary")),
        cost_estimate=pl.CostEstimate(flops=2 * Mp * Np * Kp,
                                      transcendentals=0,
                                      bytes_accessed=bytes_accessed),
    )(*args)

    if (Mp, Np) != (M, N):
        out = out[:M, :N]
    return out


# ----------------------------------------------------------------------------
# Conv / pool building blocks (glue in JAX, compute in Pallas)
# ----------------------------------------------------------------------------
def _im2col(x, kh, kw, stride, pad):
    # x: NHWC.  Gather in bf16 to halve the patch-tensor HBM traffic.
    x = x.astype(jnp.bfloat16)
    N, H, W, C = x.shape
    xp = jnp.pad(x, ((0, 0), (pad, pad), (pad, pad), (0, 0)))
    Ho = (H + 2 * pad - kh) // stride + 1
    Wo = (W + 2 * pad - kw) // stride + 1
    cols = []
    for i in range(kh):
        for j in range(kw):
            cols.append(xp[:, i:i + stride * Ho:stride, j:j + stride * Wo:stride, :])
    patches = jnp.stack(cols, axis=3)                       # (N,Ho,Wo,kh*kw,C)
    return patches.reshape(N * Ho * Wo, kh * kw * C), N, Ho, Wo


def conv_bn(x, p, stride, pad, relu, residual=None):
    kh, kw, cin, cout = p["kh"], p["kw"], p["cin"], p["cout"]
    if kh == 1 and kw == 1 and pad == 0:
        if stride > 1:
            x = x[:, ::stride, ::stride, :]
        N, Ho, Wo, _ = x.shape
        a = x.reshape(N * Ho * Wo, cin)
    else:
        a, N, Ho, Wo = _im2col(x, kh, kw, stride, pad)
    res_flat = None
    if residual is not None:
        res_flat = residual.reshape(N * Ho * Wo, cout)
    out = gemm_bn(a, p["wmat"], p["scale"], p["bias"], kh * kw * cin, cout,
                  relu, res_flat)
    return out.reshape(N, Ho, Wo, cout)


def maxpool3x3s2(x):
    N, H, W, C = x.shape
    xp = jnp.pad(x, ((0, 0), (1, 1), (1, 1), (0, 0)),
                 constant_values=-jnp.inf)
    Ho = (H + 2 - 3) // 2 + 1
    Wo = (W + 2 - 3) // 2 + 1
    cols = [xp[:, i:i + 2 * Ho:2, j:j + 2 * Wo:2, :]
            for i in range(3) for j in range(3)]
    M = N * Ho * Wo
    stk = jnp.stack(cols, axis=0).reshape(9, M, C)
    TR = min(512, _round_up(M, 8))
    Mp = _round_up(M, TR)
    if Mp != M:
        stk = jnp.pad(stk, ((0, 0), (0, Mp - M), (0, 0)))
    out = pl.pallas_call(
        _max9_kernel,
        out_shape=jax.ShapeDtypeStruct((Mp, C), x.dtype),
        grid=(Mp // TR,),
        in_specs=[pl.BlockSpec((9, TR, C), lambda r: (0, r, 0))],
        out_specs=pl.BlockSpec((TR, C), lambda r: (r, 0)),
        compiler_params=pltpu.CompilerParams(
            dimension_semantics=("parallel",)),
    )(stk)
    if Mp != M:
        out = out[:M]
    return out.reshape(N, Ho, Wo, C)


def global_avgpool(x):
    N, H, W, C = x.shape
    S = H * W
    out = pl.pallas_call(
        _avgpool_kernel,
        out_shape=jax.ShapeDtypeStruct((N, 1, C), x.dtype),
        grid=(N,),
        in_specs=[pl.BlockSpec((1, S, C), lambda n: (n, 0, 0))],
        out_specs=pl.BlockSpec((1, 1, C), lambda n: (n, 0, 0)),
        compiler_params=pltpu.CompilerParams(
            dimension_semantics=("parallel",)),
    )(x.reshape(N, S, C))
    return out.reshape(N, C)


# ----------------------------------------------------------------------------
# ResNet-50 parameters (deterministic init, pre-packed for the GEMM) & forward
# ----------------------------------------------------------------------------
def _make_conv(keys, cin, cout, kh, kw):
    w = jax.random.normal(next(keys), (cout, cin, kh, kw), jnp.float32)
    w = w * math.sqrt(2.0 / (cin * kh * kw))
    K = kh * kw * cin
    Kp, _, Np, _ = _gemm_kn(K, cout)
    wmat = jnp.transpose(w, (2, 3, 1, 0)).reshape(K, cout)
    wmat = jnp.pad(wmat, ((0, Kp - K), (0, Np - cout))).astype(jnp.bfloat16)
    # BN eval mode: gamma=1, beta=0, mean=0, var=1 -> per-channel scale/bias.
    scale = jnp.full((cout,), 1.0 / math.sqrt(1.0 + _BN_EPS), jnp.float32)
    bias = jnp.zeros((cout,), jnp.float32)
    return {"wmat": wmat,
            "scale": jnp.pad(scale, (0, Np - cout)).reshape(1, Np),
            "bias": jnp.pad(bias, (0, Np - cout)).reshape(1, Np),
            "kh": kh, "kw": kw, "cin": cin, "cout": cout}


def _make_fc(keys, cin, num_classes):
    w = jax.random.normal(next(keys), (num_classes, cin), jnp.float32)
    w = w * math.sqrt(1.0 / cin)
    b = jnp.zeros((num_classes,), jnp.float32)
    Kp, _, Np, _ = _gemm_kn(cin, num_classes)
    wmat = jnp.pad(w.T, ((0, Kp - cin), (0, Np - num_classes))).astype(jnp.bfloat16)
    ones = jnp.ones((num_classes,), jnp.float32)
    return {"wmat": wmat,
            "scale": jnp.pad(ones, (0, Np - num_classes)).reshape(1, Np),
            "bias": jnp.pad(b, (0, Np - num_classes)).reshape(1, Np),
            "k": cin, "cout": num_classes}


def _make_bottleneck(keys, cin, planes, stride):
    p = {
        "conv1": _make_conv(keys, cin, planes, 1, 1),
        "conv2": _make_conv(keys, planes, planes, 3, 3),
        "conv3": _make_conv(keys, planes, planes * 4, 1, 1),
        "stride": stride,
    }
    if stride != 1 or cin != planes * 4:
        p["downsample"] = _make_conv(keys, cin, planes * 4, 1, 1)
    return p


def make_resnet50_params(key, num_classes=1000):
    keys = iter(jax.random.split(key, 128))
    params = {"conv1": _make_conv(keys, 3, 64, 7, 7)}
    cfg = [("layer1", 64, 3, 1), ("layer2", 128, 4, 2),
           ("layer3", 256, 6, 2), ("layer4", 512, 3, 2)]
    cin = 64
    for name, planes, blocks, stride in cfg:
        layer = []
        for b in range(blocks):
            s = stride if b == 0 else 1
            layer.append(_make_bottleneck(keys, cin, planes, s))
            cin = planes * 4
        params[name] = layer
    params["fc"] = _make_fc(keys, 2048, num_classes)
    return params


def _bottleneck_forward(x, p):
    stride = p["stride"]
    if "downsample" in p:
        identity = conv_bn(x, p["downsample"], stride=stride, pad=0, relu=False)
    else:
        identity = x
    out = conv_bn(x, p["conv1"], stride=1, pad=0, relu=True)
    out = conv_bn(out, p["conv2"], stride=stride, pad=1, relu=True)
    # conv3 GEMM fuses BN, the residual add and the final ReLU in its epilogue.
    out = conv_bn(out, p["conv3"], stride=1, pad=0, relu=True, residual=identity)
    return out


def resnet50_forward(params, x_nchw):
    """x_nchw: (N, 3, H, W) float32, like the PyTorch module. Returns (N, 1000)."""
    x = jnp.transpose(x_nchw, (0, 2, 3, 1))               # NCHW -> NHWC
    x = conv_bn(x, params["conv1"], stride=2, pad=3, relu=True)
    x = maxpool3x3s2(x)
    for name in ("layer1", "layer2", "layer3", "layer4"):
        for blk in params[name]:
            x = _bottleneck_forward(x, blk)
    x = global_avgpool(x)                                  # (N, 2048)
    fc = params["fc"]
    return gemm_bn(x, fc["wmat"], fc["scale"], fc["bias"], fc["k"], fc["cout"],
                   relu=False)


# ----------------------------------------------------------------------------
if __name__ == "__main__":
    key = jax.random.PRNGKey(0)
    pkey, xkey = jax.random.split(key)
    params = make_resnet50_params(pkey)

    x = jax.random.normal(xkey, (2, 3, 32, 32), jnp.float32)  # small NCHW input
    out = resnet50_forward(params, x)
    out = jax.block_until_ready(out)

    assert out.shape == (2, 1000), out.shape
    assert bool(jnp.all(jnp.isfinite(out)))
    print("KERNEL_OK")
</pallas_src>

<mosaic_0001>
module attributes {stable_mosaic.version = 11 : i64} {
  func.func @_gemm_bn_kernel(%arg0: i32, %arg1: i32, %arg2: i32, %arg3: memref<256x147xbf16, #tpu.memory_space<vmem>>, %arg4: memref<147x128xbf16, #tpu.memory_space<vmem>>, %arg5: memref<1x128xf32, #tpu.memory_space<vmem>>, %arg6: memref<1x128xf32, #tpu.memory_space<vmem>>, %arg7: memref<256x128xf32, #tpu.memory_space<vmem>>, %arg8: memref<256x128xf32, #tpu.memory_space<vmem>>) attributes {dimension_semantics = [#tpu.dimension_semantics<parallel>, #tpu.dimension_semantics<parallel>, #tpu.dimension_semantics<arbitrary>], iteration_bounds = array<i64: 2, 1, 1>, scalar_prefetch = 0 : i64, scratch_operands = 1 : i64, tpu.core_type = #tpu.core_type<tc>, window_params = [{transform_indices = @transform_0, window_bounds = array<i64: 256, 147>}, {transform_indices = @transform_1, window_bounds = array<i64: 147, 128>}, {transform_indices = @transform_2, window_bounds = array<i64: 1, 128>}, {transform_indices = @transform_3, window_bounds = array<i64: 1, 128>}, {transform_indices = @transform_4, window_bounds = array<i64: 256, 128>}]} {
    %c0_i32 = arith.constant 0 : i32
    %0 = arith.cmpi eq, %arg2, %c0_i32 : i32
    %1 = arith.extui %0 : i1 to i32
    %c0_i32_0 = arith.constant 0 : i32
    %2 = arith.cmpi ne, %1, %c0_i32_0 : i32
    scf.if %2 {
      %cst_10 = arith.constant 0.000000e+00 : f32
      %12 = vector.broadcast %cst_10 : f32 to vector<256x128xf32>
      %c0_11 = arith.constant 0 : index
      %c0_12 = arith.constant 0 : index
      %13 = vector.load %arg8[%c0_11, %c0_12] : memref<256x128xf32, #tpu.memory_space<vmem>>, vector<256x128xf32>
      tpu.vector_store %arg8[%c0_11, %c0_12], %12 {strides = array<i32>} : memref<256x128xf32, #tpu.memory_space<vmem>>, vector<256x128xf32>,
    } else {
    }
    %c0 = arith.constant 0 : index
    %c0_1 = arith.constant 0 : index
    %3 = vector.load %arg8[%c0, %c0_1] : memref<256x128xf32, #tpu.memory_space<vmem>>, vector<256x128xf32>
    %c0_2 = arith.constant 0 : index
    %c0_3 = arith.constant 0 : index
    %4 = vector.load %arg3[%c0_2, %c0_3] : memref<256x147xbf16, #tpu.memory_space<vmem>>, vector<256x147xbf16>
    %c0_4 = arith.constant 0 : index
    %c0_5 = arith.constant 0 : index
    %5 = vector.load %arg4[%c0_4, %c0_5] : memref<147x128xbf16, #tpu.memory_space<vmem>>, vector<147x128xbf16>
    %cst = arith.constant dense<0.000000e+00> : vector<256x128xf32>
    %6 = tpu.matmul %4, %5, %cst {dimension_numbers = #tpu.dot_dimension_numbers<[1], [0], [0], [1], [0, 0, 1, 1], [], []>} : vector<256x147xbf16>, vector<147x128xbf16>, vector<256x128xf32> -> vector<256x128xf32>
    %7 = arith.addf %3, %6 : vector<256x128xf32>
    %c0_6 = arith.constant 0 : index
    %c0_7 = arith.constant 0 : index
    %8 = vector.load %arg8[%c0_6, %c0_7] : memref<256x128xf32, #tpu.memory_space<vmem>>, vector<256x128xf32>
    tpu.vector_store %arg8[%c0_6, %c0_7], %7 {strides = array<i32>} : memref<256x128xf32, #tpu.memory_space<vmem>>, vector<256x128xf32>,
    %c0_i32_8 = arith.constant 0 : i32
    %9 = arith.cmpi eq, %arg2, %c0_i32_8 : i32
    %10 = arith.extui %9 : i1 to i32
    %c0_i32_9 = arith.constant 0 : i32
    %11 = arith.cmpi ne, %10, %c0_i32_9 : i32
    scf.if %11 {
      %c0_10 = arith.constant 0 : index
      %c0_11 = arith.constant 0 : index
      %12 = vector.load %arg8[%c0_10, %c0_11] : memref<256x128xf32, #tpu.memory_space<vmem>>, vector<256x128xf32>
      %c0_12 = arith.constant 0 : index
      %c0_13 = arith.constant 0 : index
      %13 = vector.load %arg5[%c0_12, %c0_13] : memref<1x128xf32, #tpu.memory_space<vmem>>, vector<1x128xf32>
      %14 = vector.broadcast %13 : vector<1x128xf32> to vector<256x128xf32>
      %15 = arith.mulf %12, %14 : vector<256x128xf32>
      %c0_14 = arith.constant 0 : index
      %c0_15 = arith.constant 0 : index
      %16 = vector.load %arg6[%c0_14, %c0_15] : memref<1x128xf32, #tpu.memory_space<vmem>>, vector<1x128xf32>
      %17 = vector.broadcast %16 : vector<1x128xf32> to vector<256x128xf32>
      %18 = arith.addf %15, %17 : vector<256x128xf32>
      %cst_16 = arith.constant 0.000000e+00 : f32
      %19 = vector.broadcast %cst_16 : f32 to vector<256x128xf32>
      %20 = arith.maximumf %18, %19 : vector<256x128xf32>
      %c0_17 = arith.constant 0 : index
      %c0_18 = arith.constant 0 : index
      %21 = vector.load %arg7[%c0_17, %c0_18] : memref<256x128xf32, #tpu.memory_space<vmem>>, vector<256x128xf32>
      tpu.vector_store %arg7[%c0_17, %c0_18], %20 {strides = array<i32>} : memref<256x128xf32, #tpu.memory_space<vmem>>, vector<256x128xf32>,
    } else {
    }
    return
  }
  func.func @transform_0(%arg0: i32, %arg1: i32, %arg2: i32) -> (i32, i32) {
    %c0_i32 = arith.constant 0 : i32
    return %arg0, %arg2 : i32, i32
  }
  func.func @transform_1(%arg0: i32, %arg1: i32, %arg2: i32) -> (i32, i32) {
    %c0_i32 = arith.constant 0 : i32
    return %arg2, %arg1 : i32, i32
  }
  func.func @transform_2(%arg0: i32, %arg1: i32, %arg2: i32) -> (i32, i32) {
    %c0_i32 = arith.constant 0 : i32
    %c0_i32_0 = arith.constant 0 : i32
    return %c0_i32, %arg1 : i32, i32
  }
  func.func @transform_3(%arg0: i32, %arg1: i32, %arg2: i32) -> (i32, i32) {
    %c0_i32 = arith.constant 0 : i32
    %c0_i32_0 = arith.constant 0 : i32
    return %c0_i32, %arg1 : i32, i32
  }
  func.func @transform_4(%arg0: i32, %arg1: i32, %arg2: i32) -> (i32, i32) {
    %c0_i32 = arith.constant 0 : i32
    return %arg0, %arg1 : i32, i32
  }
}

</mosaic_0001>

<bundles_post_ra>
// kernel: tpu_custom_call.1
= control target key start
LH: loop header
LB: loop body
LE: loop exit
PB: predicated region body
PF: predicated region fallthrough
CT: control target
= control target key end

     0   :  { %9 = vsyncpa [#allocation4], 0  ;;  %s1975_s0 = inlined_call_operand.vmem [shape: bf16[512,147], index: 0, kind: input, shape index: {}]   ;;  %s1976_s1 = inlined_call_operand.vmem [shape: bf16[147,128], index: 1, kind: input, shape index: {}]   ;;  %s1977_s2 = inlined_call_operand.vmem [shape: f32[1,128], index: 2, kind: input, shape index: {}]   ;;  %s1978_s3 = inlined_call_operand.vmem [shape: f32[1,128], index: 3, kind: input, shape index: {}]   ;;  %s1979_s4 = inlined_call_operand.hbm [shape: f32[512,128], index: 4, kind: output, shape index: {}]  }
   0x1   :  { %11 = vsyncpa [#allocation4 + $0x1], 0  ;;  %s1648_s15 = smov 0   ;;  %s1650_s16 = smov 0  }
   0x2   :  { %s1652_s17 = smov 0   ;;  %s1654_s18 = smov 0  }
   0x3   :  { %s1656_s19 = smov 0   ;;  %s1658_s20 = smov 0  }
   0x4 LB: > { %s1230_s21 = sadd.s32 4294967295, %s1618_s20   ;;  %s1231_s22 = sadd.s32 4294967294, %s1618_s20   ;;  %s1618_s20 = sphi %s1658_s20, %s17_s20   ;;  %s1614_s19 = sphi %s1656_s19, %s1986_s19   ;;  %s1610_s18 = sphi %s1654_s18, %s1985_s18   ;;  %s1606_s17 = sphi %s1652_s17, %s1984_s17   ;;  %s1602_s16 = sphi %s1650_s16, %s1983_s16   ;;  %s1598_s15 = sphi %s1648_s15, %s1982_s15  }
   0x5   : > { %s36_s23 = sadd.s32 1, %s1614_s19  ;;  %s153_s24 = sadd.s32 1, %s1606_s17 }
   0x6   : > { %p38_p0 = scmp.ge.s32.totalorder %s36_s23, 2  ;;  %p163_p1 = scmp.ne.s32.totalorder %s1606_s17, %s1602_s16 }
   0x7   : > { %p164_p2 = scmp.eq.s32.totalorder %s1230_s21, 1  ;;  %p169_p3 = scmp.ne.s32.totalorder %s1602_s16, %s1598_s15 }
   0x8   : > { %s1988_s23 = smov (%p38_p0, %s36_s23), 0  ;;  %p170_p5 = scmp.eq.s32.totalorder %s1231_s22, 1 }
   0x9   : > { %p1688_p4 = por %p164_p2, %p163_p1  ;;  %s148_s26 = ssub.s32 %s1614_s19, %s1988_s23 }
   0xa   : > { %p1237_p6 = scmp.ge.s32.totalorder %s1618_s20, 1  ;;  %p151_p7 = scmp.eq.s32.totalorder %s148_s26, 0 }
   0xb   : > { %p1695_p8 = por %p170_p5, %p169_p3  ;;  %p227_p9 = scmp.lt.s32.totalorder %s1618_s20, 3 }
   0xc   : > { %s1701_s28 = scalar_select %p151_p7, %s1606_s17, %s153_s24  }
   0xd   : > { %p228_p10 = pnand %p1237_p6, %p227_p9 }
   0xe   : > { %s1239_s7 = sshll.u32 (!%p228_p10), %s1610_s18, 5  ;;  %s269_s14 = sand.u32 (!%p228_p10), 1, %s1602_s16  }
   0xf   : > { %231 = sbr.rel (%p228_p10) target bundleno = 316 (0x13c), region = 36  ;;  %p274_p11 = scmp.lt.s32.totalorder (!%p228_p10), %s1239_s7, 63 }
  0x10   : > { %s1469_s29 = sshll.u32 (!%p228_p10), %s1610_s18, 8  ;;  %s1091_s8 = scalar_lea.sflag (!%p228_p10), [#allocation4], %s269_s14 }
  0x11   : > { %s1103_s6 = scalar_lea.hbm (!%p228_p10), %s1979_s4, %s1469_s29  ;;  %s1560_s13 = scalar_lea.hbm (!%p228_p10), %s1979_s4, 512 }
  0x14   : > { %v1467_v0 = vld [vmem:[%s1976_s1 + $0x38] sm:$0xff]  ;;  %v419_v1 = vld [vmem:[%s1976_s1 + $0x48] sm:$0x3]  ;;  %vm670_vm0 = vcmask 1040384   ;;  %vm671_vm1 = vcmask 1041408   ;;  %v1466_v3 = vld [vmem:[%s1976_s1 + $0x30] sm:$0xff] }
  0x15   : > { %v601_v2 = vunpack.c.l.b16 %v419_v1  ;;  %677 = vmatpush.bf16.msra.mxu0 %v1467_v0  ;;  %1470 = vmatpush.bf16.msra.mxu2 %v1467_v0  ;;  %v1620_v4 = vmov 65535   ;;  %s1990_s7 = smov (!%p274_p11, %s1239_s7), 63  ;;  %v1465_v9 = vld [vmem:[%s1976_s1 + $0x28] sm:$0xff]  ;;  %v1468_v10 = vld [vmem:[%s1976_s1 + $0x40] sm:$0xff]  ;;  %vm621_vm2 = vcmask 154624   ;;  %v1463_v18 = vld [vmem:[%s1976_s1 + $0x18] sm:$0xff] }
  0x16   : > { %v672_v5 = vsel %vm670_vm0, 4294967295, %v1620_v4  ;;  %s1427_s12 = sshll.u32 %s1990_s7, 3  ;;  %v1464_v14 = vld [vmem:[%s1976_s1 + $0x20] sm:$0xff]  ;;  %v1462_v19 = vld [vmem:[%s1976_s1 + $0x10] sm:$0xff]  ;;  %v1461_v20 = vld [vmem:[%s1976_s1 + $0x8] sm:$0xff]  ;;  %s1106_s7 = sshll.u32 %s1103_s6, 4  ;;  %s1107_s7 = int_to_ptr.hbm [resolvable:$true] %s1106_s7 }
  0x17   : > { %v611_v6 = vpack.c.b16 %v601_v2, %v601_v2  ;;  %v673_v7 = vsel %vm671_vm1, %v672_v5, 0  ;;  %s1722_s24 = scalar_lea.vmem %s1975_s0, %s1427_s12  ;;  %v1460_v26 = vld [vmem:[%s1976_s1] sm:$0xff]  ;;  %s1554_s9 = sshra.s32 %s1107_s7, 4  ;;  %s1555_s9 = int_to_ptr.hbm [resolvable:$true] %s1554_s9 }
  0x18   : > { %v1428_v11 = vld [vmem:[%s1722_s24 + $0x4] sm:$0xf]  ;;  %v1246_v12 = vld [vmem:[%s1722_s24 + $0x8] sm:$0xf0]  ;;  %v1446_v15 = vld [vmem:[%s1722_s24 + $0x94] sm:$0xf]  ;;  %p1561_p1 = scmp.lt.s32.totalorder %s1555_s9, %s1979_s4 }
  0x19   : > { %v675_v8 = vand.u32 %v673_v7, %v611_v6  ;;  %678 = vmatpush.bf16.msra.mxu0 %v1466_v3  ;;  %1471 = vmatpush.bf16.msra.mxu2 %v1466_v3  ;;  %v1249_v13 = vor.u32 %v1428_v11, %v1246_v12  ;;  %v1318_v16 = vld [vmem:[%s1722_s24 + $0x98] sm:$0xf0]  ;;  %v1430_v21 = vld [vmem:[%s1722_s24 + $0x14] sm:$0xf]  ;;  %v1448_v23 = vld [vmem:[%s1722_s24 + $0xa4] sm:$0xf] }
  0x1a   : > { %v1321_v17 = vor.u32 %v1446_v15, %v1318_v16  ;;  %v1254_v22 = vld [vmem:[%s1722_s24 + $0x18] sm:$0xf0]  ;;  %v1326_v24 = vld [vmem:[%s1722_s24 + $0xa8] sm:$0xf0]  ;;  %v1244_v27 = vld [vmem:[%s1722_s24] sm:$0xf] }
  0x1b   : > { %772 = vmatpush.bf16.msra.mxu1 %v675_v8  ;;  %1478 = vmatpush.bf16.msra.mxu3 %v675_v8  ;;  %v1257_v25 = vor.u32 %v1430_v21, %v1254_v22  ;;  %v1429_v28 = vld [vmem:[%s1722_s24 + $0x4] sm:$0xf0]  ;;  %v1308_v29 = vld [vmem:[%s1722_s24 + $0x80] sm:$0xf]  ;;  %v1329_v31 = vor.u32 %v1448_v23, %v1326_v24  ;;  %v1432_v34 = vld [vmem:[%s1722_s24 + $0x24] sm:$0xf] }
  0x1c   : > { %v1445_v30 = vld [vmem:[%s1722_s24 + $0x84] sm:$0xf0]  ;;  %v1245_v32 = vor.u32 %v1429_v28, %v1244_v27  ;;  %v1262_v35 = vld [vmem:[%s1722_s24 + $0x28] sm:$0xf0]  ;;  %v1450_v36 = vld [vmem:[%s1722_s24 + $0xb4] sm:$0xf] }
  0x1d   : > { %679 = vmatpush.bf16.msra.mxu0 %v1465_v9  ;;  %1472 = vmatpush.bf16.msra.mxu2 %v1465_v9  ;;  %v1309_v33 = vor.u32 %v1445_v30, %v1308_v29  ;;  %v1334_v37 = vld [vmem:[%s1722_s24 + $0xb8] sm:$0xf0]  ;;  %v1265_v38 = vor.u32 %v1432_v34, %v1262_v35  ;;  %v1252_v39 = vld [vmem:[%s1722_s24 + $0x10] sm:$0xf]  ;;  %v1431_v40 = vld [vmem:[%s1722_s24 + $0x14] sm:$0xf0] }
  0x1e   : > { %v1316_v41 = vld [vmem:[%s1722_s24 + $0x90] sm:$0xf]  ;;  %v1447_v42 = vld [vmem:[%s1722_s24 + $0x94] sm:$0xf0]  ;;  %v1337_v43 = vor.u32 %v1450_v36, %v1334_v37  ;;  %v1253_v44 = vor.u32 %v1431_v40, %v1252_v39  ;;  %v1434_v46 = vld [vmem:[%s1722_s24 + $0x34] sm:$0xf] }
  0x1f   : > { %773 = vmatpush.bf16.msra.mxu1 %v1468_v10  ;;  %1479 = vmatpush.bf16.msra.mxu3 %v1468_v10  ;;  %v1317_v45 = vor.u32 %v1447_v42, %v1316_v41  ;;  %v1270_v47 = vld [vmem:[%s1722_s24 + $0x38] sm:$0xf0]  ;;  %v1452_v48 = vld [vmem:[%s1722_s24 + $0xc4] sm:$0xf]  ;;  %v1342_v49 = vld [vmem:[%s1722_s24 + $0xc8] sm:$0xf0] }
  0x20   : > { %v1273_v50 = vor.u32 %v1434_v46, %v1270_v47  ;;  %v1260_v51 = vld [vmem:[%s1722_s24 + $0x20] sm:$0xf]  ;;  %v1433_v52 = vld [vmem:[%s1722_s24 + $0x24] sm:$0xf0]  ;;  %v1345_v55 = vor.u32 %v1452_v48, %v1342_v49  ;;  %v1436_v58 = vld [vmem:[%s1722_s24 + $0x44] sm:$0xf] }
  0x21   : > { %680 = vmatpush.bf16.msra.mxu0 %v1464_v14  ;;  %1473 = vmatpush.bf16.msra.mxu2 %v1464_v14  ;;  %v1324_v53 = vld [vmem:[%s1722_s24 + $0xa0] sm:$0xf]  ;;  %v1449_v54 = vld [vmem:[%s1722_s24 + $0xa4] sm:$0xf0]  ;;  %v1261_v56 = vor.u32 %v1433_v52, %v1260_v51  ;;  %v1278_v59 = vld [vmem:[%s1722_s24 + $0x48] sm:$0xf0] }
  0x22   : > { %1406 = vmatmul.msk.bf16.vlgmr.msra.gmra.mxu1 %vm621_vm2, %v1249_v13  ;;  %1415 = vmatmul.msk.bf16.vlgmr.msra.gmra.mxu3 %vm621_vm2, %v1321_v17  ;;  %v1325_v57 = vor.u32 %v1449_v54, %v1324_v53  ;;  %v1454_v60 = vld [vmem:[%s1722_s24 + $0xd4] sm:$0xf]  ;;  %v1350_v61 = vld [vmem:[%s1722_s24 + $0xd8] sm:$0xf0]  ;;  %v1281_v62 = vor.u32 %v1436_v58, %v1278_v59  ;;  %v1268_v63 = vld [vmem:[%s1722_s24 + $0x30] sm:$0xf] }
  0x23   : > { %v1435_v0 = vld [vmem:[%s1722_s24 + $0x34] sm:$0xf0]  ;;  %v1332_v1 = vld [vmem:[%s1722_s24 + $0xb0] sm:$0xf]  ;;  %v1353_v3 = vor.u32 %v1454_v60, %v1350_v61  ;;  %v1438_v6 = vld [vmem:[%s1722_s24 + $0x54] sm:$0xf] }
  0x24   : > { %v1451_v2 = vld [vmem:[%s1722_s24 + $0xb4] sm:$0xf0]  ;;  %v1269_v4 = vor.u32 %v1435_v0, %v1268_v63  ;;  %v1286_v7 = vld [vmem:[%s1722_s24 + $0x58] sm:$0xf0]  ;;  %v1456_v8 = vld [vmem:[%s1722_s24 + $0xe4] sm:$0xf] }
  0x25   : > { %681 = vmatpush.bf16.msra.mxu0 %v1463_v18  ;;  %1474 = vmatpush.bf16.msra.mxu2 %v1463_v18  ;;  %v1333_v5 = vor.u32 %v1451_v2, %v1332_v1  ;;  %v1358_v9 = vld [vmem:[%s1722_s24 + $0xe8] sm:$0xf0]  ;;  %v1289_v10 = vor.u32 %v1438_v6, %v1286_v7  ;;  %v1276_v11 = vld [vmem:[%s1722_s24 + $0x40] sm:$0xf]  ;;  %v1437_v12 = vld [vmem:[%s1722_s24 + $0x44] sm:$0xf0] }
  0x26   : > { %v1340_v13 = vld [vmem:[%s1722_s24 + $0xc0] sm:$0xf]  ;;  %v1453_v14 = vld [vmem:[%s1722_s24 + $0xc4] sm:$0xf0]  ;;  %v1361_v15 = vor.u32 %v1456_v8, %v1358_v9  ;;  %v1277_v16 = vor.u32 %v1437_v12, %v1276_v11  ;;  %v1440_v18 = vld [vmem:[%s1722_s24 + $0x64] sm:$0xf] }
  0x27   : > { %v1341_v17 = vor.u32 %v1453_v14, %v1340_v13  ;;  %v1366_v21 = vld [vmem:[%s1722_s24 + $0xf8] sm:$0xf0]  ;;  %v1284_v23 = vld [vmem:[%s1722_s24 + $0x50] sm:$0xf]  ;;  %v1439_v24 = vld [vmem:[%s1722_s24 + $0x54] sm:$0xf0] }
  0x28   : > { %v1285_v28 = vor.u32 %v1439_v24, %v1284_v23  ;;  %v1442_v30 = vld [vmem:[%s1722_s24 + $0x74] sm:$0xf]  ;;  %v1441_v34 = vld [vmem:[%s1722_s24 + $0x64] sm:$0xf0]  ;;  %v1356_v35 = vld [vmem:[%s1722_s24 + $0xe0] sm:$0xf] }
  0x29   : > { %682 = vmatpush.bf16.msra.mxu0 %v1462_v19  ;;  %1475 = vmatpush.bf16.msra.mxu2 %v1462_v19  ;;  %v1294_v19 = vld [vmem:[%s1722_s24 + $0x68] sm:$0xf0]  ;;  %v1457_v36 = vld [vmem:[%s1722_s24 + $0xe4] sm:$0xf0]  ;;  %v1444_v39 = vld [vmem:[%s1722_s24 + $0x84] sm:$0xf] }
  0x2a   : > { %v1297_v22 = vor.u32 %v1440_v18, %v1294_v19  ;;  %v1310_v40 = vld [vmem:[%s1722_s24 + $0x88] sm:$0xf0]  ;;  %v1300_v42 = vld [vmem:[%s1722_s24 + $0x70] sm:$0xf]  ;;  %v1459_v46 = vld [vmem:[%s1722_s24 + $0xf4] sm:$0xf0] }
  0x2b   : > { %v1313_v41 = vor.u32 %v1444_v39, %v1310_v40  ;;  %v1822_v52 = vld [vmem:[%s1977_s2] ss:$0 sm:$0xff]  ;;  %s1556_s10 = scalar_lea.hbm %s1555_s9, 256 }
  0x2c   : > { %p1557_p12 = scmp.ne.s32.totalorder %s1555_s9, %s1556_s10  ;;  %p1562_p2 = scmp.lt.s32.totalorder %s1560_s13, %s1556_s10 }
  0x2d   : > { %683 = vmatpush.bf16.msra.mxu0 %v1461_v20  ;;  %1476 = vmatpush.bf16.msra.mxu2 %v1461_v20  ;;  %v1458_v20 = vld [vmem:[%s1722_s24 + $0xf4] sm:$0xf] }
  0x2e   : > { %v1369_v27 = vor.u32 %v1458_v20, %v1366_v21  ;;  %p1558_p13 = pnand %p1557_p12, %p1688_p4  ;;  %p1563_p3 = por %p1562_p2, %p1561_p1 }
  0x30   : > { %p1559_p0 = pneg %p1558_p13 }
  0x31   : > { %684 = vmatpush.bf16.msra.mxu0 %v1460_v26  ;;  %1477 = vmatpush.bf16.msra.mxu2 %v1460_v26  ;;  %v1455_v26 = vld [vmem:[%s1722_s24 + $0xd4] sm:$0xf0] }
  0x32   : > { %1407 = vmatmul.msk.bf16.gmra.mxu1 %vm621_vm2, %v1257_v25  ;;  %1416 = vmatmul.msk.bf16.gmra.mxu3 %vm621_vm2, %v1329_v31  ;;  %v1348_v25 = vld [vmem:[%s1722_s24 + $0xd0] sm:$0xf]  ;;  %v1302_v31 = vld [vmem:[%s1722_s24 + $0x78] sm:$0xf0]  ;;  %p1564_p5 = pnand %p1563_p3, %p1559_p0 }
  0x33   : > { %v1349_v29 = vor.u32 %v1455_v26, %v1348_v25 }
  0x34   : > { %685 = vmatmul.bf16.vlgmr.msra.gmra.mxu0 %v1245_v32  ;;  %725 = vmatmul.bf16.vlgmr.msra.gmra.mxu2 %v1309_v33  ;;  %v1305_v32 = vor.u32 %v1442_v30, %v1302_v31  ;;  %v1292_v33 = vld [vmem:[%s1722_s24 + $0x60] sm:$0xf] }
  0x35   : > { %v1293_v37 = vor.u32 %v1441_v34, %v1292_v33 }
  0x42   : > { %1408 = vmatmul.msk.bf16.gmra.mxu1 %vm621_vm2, %v1265_v38  ;;  %1417 = vmatmul.msk.bf16.gmra.mxu3 %vm621_vm2, %v1337_v43  ;;  %v1357_v38 = vor.u32 %v1457_v36, %v1356_v35  ;;  %v1443_v43 = vld [vmem:[%s1722_s24 + $0x74] sm:$0xf0] }
  0x43   : > { %v1301_v47 = vor.u32 %v1443_v43, %v1300_v42 }
  0x44   : > { %690 = vmatmul.bf16.gmra.mxu0 %v1253_v44  ;;  %730 = vmatmul.bf16.gmra.mxu2 %v1317_v45  ;;  %v1364_v45 = vld [vmem:[%s1722_s24 + $0xf0] sm:$0xf]  ;;  %s1238_s24 = sshll.u32 %s269_s14, 8 }
  0x45   : > { %v1365_v48 = vor.u32 %v1459_v46, %v1364_v45  ;;  %s1836_s26 = scalar_lea.vmem [#allocation3], %s1238_s24 }
  0x46   : > { %s1104_s18 = sshll.u32 %s1836_s26, 4  ;;  %s1105_s18 = int_to_ptr.vmem [resolvable:$true] %s1104_s18 }
  0x52   : > { %1409 = vmatmul.msk.bf16.gmra.mxu1 %vm621_vm2, %v1273_v50  ;;  %1418 = vmatmul.msk.bf16.gmra.mxu3 %vm621_vm2, %v1345_v55  ;;  %v1828_v55 = vld [vmem:[%s1978_s3] ss:$0 sm:$0xff] }
  0x54   : > { %695 = vmatmul.bf16.gmra.mxu0 %v1261_v56  ;;  %735 = vmatmul.bf16.gmra.mxu2 %v1325_v57 }
  0x62   : > { %1410 = vmatmul.msk.bf16.gmra.mxu1 %vm621_vm2, %v1281_v62  ;;  %1419 = vmatmul.msk.bf16.gmra.mxu3 %vm621_vm2, %v1353_v3 }
  0x64   : > { %700 = vmatmul.bf16.gmra.mxu0 %v1269_v4  ;;  %740 = vmatmul.bf16.gmra.mxu2 %v1333_v5 }
  0x72   : > { %1411 = vmatmul.msk.bf16.gmra.mxu1 %vm621_vm2, %v1289_v10  ;;  %1420 = vmatmul.msk.bf16.gmra.mxu3 %vm621_vm2, %v1361_v15 }
  0x74   : > { %705 = vmatmul.bf16.gmra.mxu0 %v1277_v16  ;;  %745 = vmatmul.bf16.gmra.mxu2 %v1341_v17 }
  0x82   : > { %1412 = vmatmul.msk.bf16.gmra.mxu1 %vm621_vm2, %v1297_v22  ;;  %1421 = vmatmul.msk.bf16.gmra.mxu3 %vm621_vm2, %v1369_v27 }
  0x84   : > { %710 = vmatmul.bf16.gmra.mxu0 %v1285_v28  ;;  %750 = vmatmul.bf16.gmra.mxu2 %v1349_v29 }
  0x92   : > { %1413 = vmatmul.msk.bf16.gmra.mxu1 %vm621_vm2, %v1305_v32 }
  0x94   : > { %715 = vmatmul.bf16.gmra.mxu0 %v1293_v37  ;;  %755 = vmatmul.bf16.gmra.mxu2 %v1357_v38 }
  0x9f   : > { %v775_v44 = vpop.f32.mrf.mxu1 }
  0xa2   : > { %1414 = vmatmul.msk.bf16.gmra.mxu1 %vm621_vm2, %v1313_v41 }
  0xa4   : > { %720 = vmatmul.bf16.gmra.mxu0 %v1301_v47  ;;  %760 = vmatmul.bf16.gmra.mxu2 %v1365_v48 }
  0xa5   : > { %v820_v51 = vpop.f32.mrf.mxu3 }
  0xa7   : > { %v777_v49 = vpop.f32.mrf.mxu1 }
  0xad   : > { %v822_v61 = vpop.f32.mrf.mxu3 }
  0xaf   : > { %v780_v50 = vpop.f32.mrf.mxu1 }
  0xb1   : > { %v686_v53 = vpop.f32.mrf.mxu0 }
  0xb2   : > { %v776_v54 = vadd.f32 %v775_v44, %v686_v53 }
  0xb4   : > { %v958_v56 = vmul.f32 %v1822_v52, %v776_v54 }
  0xb5   : > { %v825_v7 = vpop.f32.mrf.mxu3 }
  0xb6   : > { %v994_v57 = vadd.f32 %v1828_v55, %v958_v56 }
  0xb7   : > { %v782_v58 = vpop.f32.mrf.mxu1  ;;  %v1834_v60 = vpop.f32.mrf.mxu2 }
  0xb8   : > { %v1026_v59 = vmax.f32 %v994_v57, 0.0 }
  0xb9   : > { %v688_v62 = vpop.f32.mrf.mxu0 }
  0xba   : > { %1058 = vst [vmem:[%s1836_s26] sm:$0xff] %v1026_v59  ;;  %v778_v63 = vadd.f32 %v777_v49, %v688_v62 }
  0xbc   : > { %v959_v0 = vmul.f32 %v1822_v52, %v778_v63 }
  0xbd   : > { %v827_v18 = vpop.f32.mrf.mxu3 }
  0xbe   : > { %v995_v1 = vadd.f32 %v1828_v55, %v959_v0 }
  0xbf   : > { %v785_v2 = vpop.f32.mrf.mxu1  ;;  %v1841_v4 = vpop.f32.mrf.mxu2 }
  0xc0   : > { %v1027_v3 = vmax.f32 %v995_v1, 0.0 }
  0xc1   : > { %v691_v5 = vpop.f32.mrf.mxu0 }
  0xc2   : > { %1059 = vst [vmem:[%s1836_s26 + $0x8] sm:$0xff] %v1027_v3  ;;  %v781_v6 = vadd.f32 %v780_v50, %v691_v5 }
  0xc4   : > { %v960_v8 = vmul.f32 %v1822_v52, %v781_v6 }
  0xc5   : > { %v830_v33 = vpop.f32.mrf.mxu3 }
  0xc6   : > { %v996_v9 = vadd.f32 %v1828_v55, %v960_v8 }
  0xc7   : > { %v787_v10 = vpop.f32.mrf.mxu1  ;;  %v731_v12 = vpop.f32.mrf.mxu2 }
  0xc8   : > { %v1028_v11 = vmax.f32 %v996_v9, 0.0  ;;  %v821_v13 = vadd.f32 %v820_v51, %v731_v12 }
  0xc9   : > { %v693_v14 = vpop.f32.mrf.mxu0 }
  0xca   : > { %1060 = vst [vmem:[%s1836_s26 + $0x10] sm:$0xff] %v1028_v11  ;;  %v783_v15 = vadd.f32 %v782_v58, %v693_v14  ;;  %v976_v16 = vmul.f32 %v1822_v52, %v821_v13 }
  0xcc   : > { %v961_v17 = vmul.f32 %v1822_v52, %v783_v15  ;;  %v1012_v19 = vadd.f32 %v1828_v55, %v976_v16 }
  0xcd   : > { %v832_v48 = vpop.f32.mrf.mxu3 }
  0xce   : > { %v997_v20 = vadd.f32 %v1828_v55, %v961_v17  ;;  %v1044_v22 = vmax.f32 %v1012_v19, 0.0 }
  0xcf   : > { %v790_v21 = vpop.f32.mrf.mxu1  ;;  %v733_v24 = vpop.f32.mrf.mxu2 }
  0xd0   : > { %v1029_v23 = vmax.f32 %v997_v20, 0.0  ;;  %1076 = vst [vmem:[%s1836_s26 + $0x90] sm:$0xff] %v1044_v22  ;;  %v823_v25 = vadd.f32 %v822_v61, %v733_v24 }
  0xd1   : > { %v696_v26 = vpop.f32.mrf.mxu0 }
  0xd2   : > { %1061 = vst [vmem:[%s1836_s26 + $0x18] sm:$0xff] %v1029_v23  ;;  %v786_v27 = vadd.f32 %v785_v2, %v696_v26  ;;  %v977_v28 = vmul.f32 %v1822_v52, %v823_v25 }
  0xd4   : > { %v962_v29 = vmul.f32 %v1822_v52, %v786_v27  ;;  %v1013_v30 = vadd.f32 %v1828_v55, %v977_v28 }
  0xd5   : > { %v835_v2 = vpop.f32.mrf.mxu3 }
  0xd6   : > { %v998_v31 = vadd.f32 %v1828_v55, %v962_v29  ;;  %v1045_v34 = vmax.f32 %v1013_v30, 0.0 }
  0xd7   : > { %v792_v32 = vpop.f32.mrf.mxu1  ;;  %v736_v36 = vpop.f32.mrf.mxu2 }
  0xd8   : > { %v1030_v35 = vmax.f32 %v998_v31, 0.0  ;;  %1077 = vst [vmem:[%s1836_s26 + $0x98] sm:$0xff] %v1045_v34  ;;  %v826_v37 = vadd.f32 %v825_v7, %v736_v36 }
  0xd9   : > { %v698_v38 = vpop.f32.mrf.mxu0 }
  0xda   : > { %1062 = vst [vmem:[%s1836_s26 + $0x20] sm:$0xff] %v1030_v35  ;;  %v788_v39 = vadd.f32 %v787_v10, %v698_v38  ;;  %v978_v40 = vmul.f32 %v1822_v52, %v826_v37 }
  0xdc   : > { %v963_v41 = vmul.f32 %v1822_v52, %v788_v39  ;;  %v1014_v42 = vadd.f32 %v1828_v55, %v978_v40 }
  0xdd   : > { %v837_v17 = vpop.f32.mrf.mxu3 }
  0xde   : > { %v999_v43 = vadd.f32 %v1828_v55, %v963_v41  ;;  %v1046_v45 = vmax.f32 %v1014_v42, 0.0 }
  0xdf   : > { %v795_v44 = vpop.f32.mrf.mxu1  ;;  %v738_v47 = vpop.f32.mrf.mxu2 }
  0xe0   : > { %v1031_v46 = vmax.f32 %v999_v43, 0.0  ;;  %1078 = vst [vmem:[%s1836_s26 + $0xa0] sm:$0xff] %v1046_v45  ;;  %v828_v49 = vadd.f32 %v827_v18, %v738_v47 }
  0xe1   : > { %v701_v50 = vpop.f32.mrf.mxu0 }
  0xe2   : > { %1063 = vst [vmem:[%s1836_s26 + $0x28] sm:$0xff] %v1031_v46  ;;  %v791_v51 = vadd.f32 %v790_v21, %v701_v50  ;;  %v979_v53 = vmul.f32 %v1822_v52, %v828_v49 }
  0xe4   : > { %v964_v54 = vmul.f32 %v1822_v52, %v791_v51  ;;  %v1015_v56 = vadd.f32 %v1828_v55, %v979_v53 }
  0xe6   : > { %v1000_v57 = vadd.f32 %v1828_v55, %v964_v54  ;;  %v1047_v59 = vmax.f32 %v1015_v56, 0.0 }
  0xe7   : > { %v797_v58 = vpop.f32.mrf.mxu1  ;;  %v741_v62 = vpop.f32.mrf.mxu2 }
  0xe8   : > { %v1032_v61 = vmax.f32 %v1000_v57, 0.0  ;;  %1079 = vst [vmem:[%s1836_s26 + $0xa8] sm:$0xff] %v1047_v59  ;;  %v831_v63 = vadd.f32 %v830_v33, %v741_v62 }
  0xe9   : > { %v703_v0 = vpop.f32.mrf.mxu0 }
  0xea   : > { %1064 = vst [vmem:[%s1836_s26 + $0x30] sm:$0xff] %v1032_v61  ;;  %v793_v1 = vadd.f32 %v792_v32, %v703_v0  ;;  %v980_v3 = vmul.f32 %v1822_v52, %v831_v63  ;;  %v840_v32 = vpop.f32.mrf.mxu3 }
  0xec   : > { %v965_v5 = vmul.f32 %v1822_v52, %v793_v1  ;;  %v1016_v6 = vadd.f32 %v1828_v55, %v980_v3 }
  0xee   : > { %v1001_v7 = vadd.f32 %v1828_v55, %v965_v5  ;;  %v1048_v9 = vmax.f32 %v1016_v6, 0.0 }
  0xef   : > { %v800_v8 = vpop.f32.mrf.mxu1  ;;  %v743_v11 = vpop.f32.mrf.mxu2 }
  0xf0   : > { %v1033_v10 = vmax.f32 %v1001_v7, 0.0  ;;  %1080 = vst [vmem:[%s1836_s26 + $0xb0] sm:$0xff] %v1048_v9  ;;  %v833_v12 = vadd.f32 %v832_v48, %v743_v11 }
  0xf1   : > { %v706_v13 = vpop.f32.mrf.mxu0 }
  0xf2   : > { %1065 = vst [vmem:[%s1836_s26 + $0x38] sm:$0xff] %v1033_v10  ;;  %v796_v14 = vadd.f32 %v795_v44, %v706_v13  ;;  %v981_v15 = vmul.f32 %v1822_v52, %v833_v12  ;;  %v842_v47 = vpop.f32.mrf.mxu3 }
  0xf4   : > { %v966_v16 = vmul.f32 %v1822_v52, %v796_v14  ;;  %v1017_v18 = vadd.f32 %v1828_v55, %v981_v15 }
  0xf6   : > { %v1002_v19 = vadd.f32 %v1828_v55, %v966_v16  ;;  %v1049_v21 = vmax.f32 %v1017_v18, 0.0 }
  0xf7   : > { %v802_v20 = vpop.f32.mrf.mxu1  ;;  %v746_v23 = vpop.f32.mrf.mxu2 }
  0xf8   : > { %v1034_v22 = vmax.f32 %v1002_v19, 0.0  ;;  %1081 = vst [vmem:[%s1836_s26 + $0xb8] sm:$0xff] %v1049_v21  ;;  %v836_v24 = vadd.f32 %v835_v2, %v746_v23 }
  0xf9   : > { %v708_v25 = vpop.f32.mrf.mxu0 }
  0xfa   : > { %1066 = vst [vmem:[%s1836_s26 + $0x40] sm:$0xff] %v1034_v22  ;;  %v798_v26 = vadd.f32 %v797_v58, %v708_v25  ;;  %v982_v27 = vmul.f32 %v1822_v52, %v836_v24  ;;  %v845_v0 = vpop.f32.mrf.mxu3 }
  0xfc   : > { %v967_v28 = vmul.f32 %v1822_v52, %v798_v26  ;;  %v1018_v29 = vadd.f32 %v1828_v55, %v982_v27 }
  0xfe   : > { %v1003_v30 = vadd.f32 %v1828_v55, %v967_v28  ;;  %v1050_v33 = vmax.f32 %v1018_v29, 0.0 }
  0xff   : > { %v805_v31 = vpop.f32.mrf.mxu1  ;;  %v748_v35 = vpop.f32.mrf.mxu2 }
 0x100   : > { %v1035_v34 = vmax.f32 %v1003_v30, 0.0  ;;  %1082 = vst [vmem:[%s1836_s26 + $0xc0] sm:$0xff] %v1050_v33  ;;  %v838_v36 = vadd.f32 %v837_v17, %v748_v35 }
 0x101   : > { %v711_v37 = vpop.f32.mrf.mxu0 }
 0x102   : > { %1067 = vst [vmem:[%s1836_s26 + $0x48] sm:$0xff] %v1035_v34  ;;  %v801_v38 = vadd.f32 %v800_v8, %v711_v37  ;;  %v983_v39 = vmul.f32 %v1822_v52, %v838_v36  ;;  %v847_v15 = vpop.f32.mrf.mxu3 }
 0x104   : > { %v968_v40 = vmul.f32 %v1822_v52, %v801_v38  ;;  %v1019_v41 = vadd.f32 %v1828_v55, %v983_v39 }
 0x106   : > { %v1004_v42 = vadd.f32 %v1828_v55, %v968_v40  ;;  %v1051_v44 = vmax.f32 %v1019_v41, 0.0 }
 0x107   : > { %v807_v43 = vpop.f32.mrf.mxu1  ;;  %v751_v46 = vpop.f32.mrf.mxu2 }
 0x108   : > { %v1036_v45 = vmax.f32 %v1004_v42, 0.0  ;;  %1083 = vst [vmem:[%s1836_s26 + $0xc8] sm:$0xff] %v1051_v44  ;;  %v841_v48 = vadd.f32 %v840_v32, %v751_v46 }
 0x109   : > { %v713_v49 = vpop.f32.mrf.mxu0 }
 0x10a   : > { %1068 = vst [vmem:[%s1836_s26 + $0x50] sm:$0xff] %v1036_v45  ;;  %v803_v50 = vadd.f32 %v802_v20, %v713_v49  ;;  %v984_v51 = vmul.f32 %v1822_v52, %v841_v48  ;;  %v850_v32 = vpop.f32.mrf.mxu3 }
 0x10c   : > { %v969_v53 = vmul.f32 %v1822_v52, %v803_v50  ;;  %v1020_v54 = vadd.f32 %v1828_v55, %v984_v51 }
 0x10e   : > { %v1005_v56 = vadd.f32 %v1828_v55, %v969_v53  ;;  %v1052_v58 = vmax.f32 %v1020_v54, 0.0 }
 0x10f   : > { %v810_v57 = vpop.f32.mrf.mxu1  ;;  %v753_v61 = vpop.f32.mrf.mxu2 }
 0x110   : > { %v1037_v59 = vmax.f32 %v1005_v56, 0.0  ;;  %1084 = vst [vmem:[%s1836_s26 + $0xd0] sm:$0xff] %v1052_v58  ;;  %v843_v62 = vadd.f32 %v842_v47, %v753_v61 }
 0x111   : > { %v716_v63 = vpop.f32.mrf.mxu0 }
 0x112   : > { %1069 = vst [vmem:[%s1836_s26 + $0x58] sm:$0xff] %v1037_v59  ;;  %v806_v1 = vadd.f32 %v805_v31, %v716_v63  ;;  %v985_v2 = vmul.f32 %v1822_v52, %v843_v62  ;;  %v852_v49 = vpop.f32.mrf.mxu3 }
 0x114   : > { %v970_v3 = vmul.f32 %v1822_v52, %v806_v1  ;;  %v1021_v5 = vadd.f32 %v1828_v55, %v985_v2 }
 0x116   : > { %v1006_v6 = vadd.f32 %v1828_v55, %v970_v3  ;;  %v1053_v8 = vmax.f32 %v1021_v5, 0.0 }
 0x117   : > { %v812_v7 = vpop.f32.mrf.mxu1  ;;  %v756_v10 = vpop.f32.mrf.mxu2 }
 0x118   : > { %v1038_v9 = vmax.f32 %v1006_v6, 0.0  ;;  %1085 = vst [vmem:[%s1836_s26 + $0xd8] sm:$0xff] %v1053_v8  ;;  %v846_v11 = vadd.f32 %v845_v0, %v756_v10 }
 0x119   : > { %v718_v12 = vpop.f32.mrf.mxu0 }
 0x11a   : > { %1070 = vst [vmem:[%s1836_s26 + $0x60] sm:$0xff] %v1038_v9  ;;  %v808_v13 = vadd.f32 %v807_v43, %v718_v12  ;;  %v986_v14 = vmul.f32 %v1822_v52, %v846_v11 }
 0x11c   : > { %v971_v16 = vmul.f32 %v1822_v52, %v808_v13  ;;  %v1022_v17 = vadd.f32 %v1828_v55, %v986_v14 }
 0x11e   : > { %v1007_v18 = vadd.f32 %v1828_v55, %v971_v16  ;;  %v1054_v20 = vmax.f32 %v1022_v17, 0.0 }
 0x11f   : > { %v815_v19 = vpop.f32.mrf.mxu1  ;;  %v758_v23 = vpop.f32.mrf.mxu2 }
 0x120   : > { %v816_v21 = vadd.f32 %v815_v19, %v1834_v60  ;;  %v1039_v22 = vmax.f32 %v1007_v18, 0.0  ;;  %1086 = vst [vmem:[%s1836_s26 + $0xe0] sm:$0xff] %v1054_v20  ;;  %v848_v25 = vadd.f32 %v847_v15, %v758_v23 }
 0x121   : > { %v721_v26 = vpop.f32.mrf.mxu0 }
 0x122   : > { %v974_v24 = vmul.f32 %v1822_v52, %v816_v21  ;;  %1071 = vst [vmem:[%s1836_s26 + $0x68] sm:$0xff] %v1039_v22  ;;  %v811_v27 = vadd.f32 %v810_v57, %v721_v26  ;;  %v987_v29 = vmul.f32 %v1822_v52, %v848_v25 }
 0x124   : > { %v1010_v28 = vadd.f32 %v1828_v55, %v974_v24  ;;  %v972_v30 = vmul.f32 %v1822_v52, %v811_v27  ;;  %v1023_v60 = vadd.f32 %v1828_v55, %v987_v29 }
 0x126   : > { %v1042_v31 = vmax.f32 %v1010_v28, 0.0  ;;  %v1008_v33 = vadd.f32 %v1828_v55, %v972_v30  ;;  %v1055_v35 = vmax.f32 %v1023_v60, 0.0 }
 0x127   : > { %v817_v34 = vpop.f32.mrf.mxu1  ;;  %v761_v38 = vpop.f32.mrf.mxu2 }
 0x128   : > { %1074 = vst [vmem:[%s1836_s26 + $0x80] sm:$0xff] %v1042_v31  ;;  %v818_v36 = vadd.f32 %v817_v34, %v1841_v4  ;;  %v1040_v37 = vmax.f32 %v1008_v33, 0.0  ;;  %v851_v40 = vadd.f32 %v850_v32, %v761_v38 }
 0x129   : > { %1087 = vst [vmem:[%s1836_s26 + $0xe8] sm:$0xff] %v1055_v35  ;;  %v723_v41 = vpop.f32.mrf.mxu0 }
 0x12a   : > { %v975_v39 = vmul.f32 %v1822_v52, %v818_v36  ;;  %1072 = vst [vmem:[%s1836_s26 + $0x70] sm:$0xff] %v1040_v37  ;;  %v813_v42 = vadd.f32 %v812_v7, %v723_v41  ;;  %v988_v44 = vmul.f32 %v1822_v52, %v851_v40 }
 0x12c   : > { %v1011_v43 = vadd.f32 %v1828_v55, %v975_v39  ;;  %v973_v45 = vmul.f32 %v1822_v52, %v813_v42  ;;  %v1024_v46 = vadd.f32 %v1828_v55, %v988_v44 }
 0x12e   : > { %v1043_v4 = vmax.f32 %v1011_v43, 0.0  ;;  %v1009_v47 = vadd.f32 %v1828_v55, %v973_v45  ;;  %v1056_v48 = vmax.f32 %v1024_v46, 0.0 }
 0x12f   : > { %v763_v51 = vpop.f32.mrf.mxu2 }
 0x130   : > { %1075 = vst [vmem:[%s1836_s26 + $0x88] sm:$0xff] %v1043_v4  ;;  %v1041_v50 = vmax.f32 %v1009_v47, 0.0  ;;  %v853_v53 = vadd.f32 %v852_v49, %v763_v51 }
 0x131   : > { %1088 = vst [vmem:[%s1836_s26 + $0xf0] sm:$0xff] %v1056_v48 }
 0x132   : > { %1073 = vst [vmem:[%s1836_s26 + $0x78] sm:$0xff] %v1041_v50  ;;  %v989_v54 = vmul.f32 %v1822_v52, %v853_v53 }
 0x134   : > { %v1025_v56 = vadd.f32 %v1828_v55, %v989_v54 }
 0x136   : > { %v1057_v57 = vmax.f32 %v1025_v56, 0.0 }
 0x138   : > { %1089 = vst [vmem:[%s1836_s26 + $0xf8] sm:$0xff] %v1057_v57 }
 0x139   : > { %1567 = shalt.err (!%p1564_p5)
}
 0x13a   : > { %s1621_s14 = smov 128   ;;  %s1622_s24 = smov 8  }
 0x13b   : > { %1480 = dma.vmem_to_hbm [thread:$0]  (%p1688_p4), %s1105_s18, 4096, %s1107_s7, %s1091_s8, %s1621_s14, %s1621_s14, %s1622_s24  }
 0x13c PF: > { %p1486_p6 = scmp.ge.s32.totalorder %s1618_s20, 2  ;;  %s1121_s26 = sand.u32 1, %s1598_s15  }
 0x13d   : > { %s1122_s29 = scalar_lea.sflag [#allocation4], %s1121_s26 }
 0x13e   : > { %p1483_p7 = pnand %p1486_p6, %p1695_p8 }
 0x140   : > { %p1484_p9 = pneg %p1483_p7 }
 0x142   : > { %1593 = dma.done.wait (%p1484_p9), %s1122_s29, 4096  }
 0x143   : > { %1595 = vsyncadd (%p1484_p9), %s1122_s29, 4294963200  ;;  %s17_s20 = sadd.s32 1, %s1618_s20   ;;  %s1982_s15 = smov %s1602_s16 }
 0x144   : > { %p14_p10 = scmp.ge.s32.totalorder %s17_s20, 4   ;;  %s1983_s16 = smov %s1606_s17 }
 0x145   : > { %s1984_s17 = smov %s1701_s28  ;;  %s1985_s18 = smov %s1614_s19 }
 0x146   : > { %s1986_s19 = smov %s1988_s23  ;;  %16 = sbr.rel (!%p14_p10) target bundleno = 4 (0x4), region = 88 }
 0x14b   :  { %1128 = vsyncpa [#allocation4], 1 }
 0x14c   :  { %1130 = vsyncpa [#allocation4 + $0x1], 1 }

</bundles_post_ra>
